<compile_context>
chip_gen: v6e
topology: v6e:2x2x1
jax: 0.10.0
libtpu: 0.0.40
codegen_flags: <defaults>
</compile_context>

<pallas_src>
import jax
import jax.numpy as jnp
import numpy as np
from jax.experimental import pallas as pl
from jax.experimental.pallas import tpu as pltpu

POOL_KH = 9   # avg_pool2d kernel_size=(9, 1), stride=(1, 1)


def _hmax_pool_kernel(x_ref, o_ref):
    """Sliding avg over H (kernel 9, stride 1), then max over W, per C-tile."""
    x = x_ref[...].astype(jnp.float32)              # (N, H, W, C_TILE)
    h_out = o_ref.shape[1]                          # H - POOL_KH + 1
    # Windowed sum over H as 9 shifted adds.  In NHWC, H is a major axis
    # (the tiled (sublane, lane) dims are (W, C)), so every slice is aligned:
    # no cross-lane relayouts and no large temporaries are materialized.
    acc = x[:, 0:h_out, :, :]
    for dh in range(1, POOL_KH):
        acc = acc + x[:, dh:dh + h_out, :, :]
    avg = acc * (1.0 / POOL_KH)                     # (N, H_out, W, C_TILE)
    # max_pool2d(kernel=(1, W)) == max over the W (sublane) axis -> XLU reduce.
    o_ref[...] = jnp.max(avg, axis=2).astype(o_ref.dtype)   # (N, H_out, C_TILE)


def _pick_c_tile(c):
    # Largest lane-aligned tile that divides C; keeps 2 * N*H*W*c_tile*4 B of
    # double-buffered input comfortably under VMEM on every generation.
    for t in (512, 256, 128):
        if c % t == 0:
            return t
    return c   # full channel dim (block == array dim is always legal)


def horizontal_max_pool_nhwc(x_nhwc):
    n, h, w, c = x_nhwc.shape
    assert h >= POOL_KH, "avg_pool2d(kernel=(9,1)) needs H >= 9"
    h_out = h - POOL_KH + 1
    c_tile = _pick_c_tile(c)
    return pl.pallas_call(
        _hmax_pool_kernel,
        grid=(c // c_tile,),
        in_specs=[pl.BlockSpec((n, h, w, c_tile), lambda ci: (0, 0, 0, ci))],
        out_specs=pl.BlockSpec((n, h_out, c_tile), lambda ci: (0, 0, ci)),
        out_shape=jax.ShapeDtypeStruct((n, h_out, c), jnp.float32),
        compiler_params=pltpu.CompilerParams(
            # C tiles are fully independent -> megacore-shard them (v7x 2 TCs).
            dimension_semantics=("parallel",)),
    )(x_nhwc)


@jax.jit
def horizontal_max_pool(x_nchw):
    """PyTorch-shaped entry point: (N, C, H, W) -> (N, C, H-8, 1)."""
    # TODO(synk): the NCHW<->NHWC transposes below are XLA HBM round trips; if
    # the producing backbone can emit NHWC directly, call
    # horizontal_max_pool_nhwc and skip them.
    x = jnp.transpose(x_nchw, (0, 2, 3, 1))            # NCHW -> NHWC
    y = horizontal_max_pool_nhwc(x)                    # (N, H_out, C)
    return jnp.transpose(y, (0, 2, 1))[..., None]      # (N, C, H_out, 1)


def reference_forward(x_nchw):
    """Pure-JAX mirror of HorizontalMaxPool2d.forward (NCHW)."""
    x = x_nchw.astype(jnp.float32)
    n, c, h, w = x.shape
    h_out = h - POOL_KH + 1
    avg = jnp.stack([x[:, :, i:i + POOL_KH, :].mean(axis=2)
                     for i in range(h_out)], axis=2)   # (N, C, H_out, W)
    return jnp.max(avg, axis=3, keepdims=True)         # (N, C, H_out, 1)


if __name__ == "__main__":
    # Small shapes consistent with the module geometry: H >= 9 (pool kernel),
    # C a multiple of 128 so the channel dim is lane-dense and the grid has
    # more than one step (exercises the pipelined C tiling).
    N, C, H, W = 2, 256, 16, 8
    x = jax.random.normal(jax.random.PRNGKey(0), (N, C, H, W), dtype=jnp.float32)

    out = jax.block_until_ready(horizontal_max_pool(x))
    ref = reference_forward(x)
    assert out.shape == (N, C, H - POOL_KH + 1, 1), out.shape
    np.testing.assert_allclose(np.asarray(out), np.asarray(ref),
                               rtol=1e-5, atol=1e-5)
    print("KERNEL_OK")
</pallas_src>

<mosaic_0001>
module attributes {stable_mosaic.version = 11 : i64} {
  func.func @_hmax_pool_kernel(%arg0: i32, %arg1: memref<2x16x8x256xf32, #tpu.memory_space<vmem>>, %arg2: memref<2x8x256xf32, #tpu.memory_space<vmem>>) attributes {dimension_semantics = [#tpu.dimension_semantics<parallel>], iteration_bounds = array<i64: 1>, scalar_prefetch = 0 : i64, scratch_operands = 0 : i64, tpu.core_type = #tpu.core_type<tc>, window_params = [{transform_indices = @transform_0, window_bounds = array<i64: 2, 16, 8, 256>}, {transform_indices = @transform_1, window_bounds = array<i64: 2, 8, 256>}]} {
    %c0 = arith.constant 0 : index
    %c0_0 = arith.constant 0 : index
    %c0_1 = arith.constant 0 : index
    %c0_2 = arith.constant 0 : index
    %0 = vector.load %arg1[%c0, %c0_0, %c0_1, %c0_2] : memref<2x16x8x256xf32, #tpu.memory_space<vmem>>, vector<2x16x8x256xf32>
    %1 = vector.extract_strided_slice %0 {offsets = [0, 0, 0, 0], sizes = [2, 8, 8, 256], strides = [1, 1, 1, 1]} : vector<2x16x8x256xf32> to vector<2x8x8x256xf32>
    %2 = vector.extract_strided_slice %0 {offsets = [0, 1, 0, 0], sizes = [2, 8, 8, 256], strides = [1, 1, 1, 1]} : vector<2x16x8x256xf32> to vector<2x8x8x256xf32>
    %3 = arith.addf %1, %2 : vector<2x8x8x256xf32>
    %4 = vector.extract_strided_slice %0 {offsets = [0, 2, 0, 0], sizes = [2, 8, 8, 256], strides = [1, 1, 1, 1]} : vector<2x16x8x256xf32> to vector<2x8x8x256xf32>
    %5 = arith.addf %3, %4 : vector<2x8x8x256xf32>
    %6 = vector.extract_strided_slice %0 {offsets = [0, 3, 0, 0], sizes = [2, 8, 8, 256], strides = [1, 1, 1, 1]} : vector<2x16x8x256xf32> to vector<2x8x8x256xf32>
    %7 = arith.addf %5, %6 : vector<2x8x8x256xf32>
    %8 = vector.extract_strided_slice %0 {offsets = [0, 4, 0, 0], sizes = [2, 8, 8, 256], strides = [1, 1, 1, 1]} : vector<2x16x8x256xf32> to vector<2x8x8x256xf32>
    %9 = arith.addf %7, %8 : vector<2x8x8x256xf32>
    %10 = vector.extract_strided_slice %0 {offsets = [0, 5, 0, 0], sizes = [2, 8, 8, 256], strides = [1, 1, 1, 1]} : vector<2x16x8x256xf32> to vector<2x8x8x256xf32>
    %11 = arith.addf %9, %10 : vector<2x8x8x256xf32>
    %12 = vector.extract_strided_slice %0 {offsets = [0, 6, 0, 0], sizes = [2, 8, 8, 256], strides = [1, 1, 1, 1]} : vector<2x16x8x256xf32> to vector<2x8x8x256xf32>
    %13 = arith.addf %11, %12 : vector<2x8x8x256xf32>
    %14 = vector.extract_strided_slice %0 {offsets = [0, 7, 0, 0], sizes = [2, 8, 8, 256], strides = [1, 1, 1, 1]} : vector<2x16x8x256xf32> to vector<2x8x8x256xf32>
    %15 = arith.addf %13, %14 : vector<2x8x8x256xf32>
    %16 = vector.extract_strided_slice %0 {offsets = [0, 8, 0, 0], sizes = [2, 8, 8, 256], strides = [1, 1, 1, 1]} : vector<2x16x8x256xf32> to vector<2x8x8x256xf32>
    %17 = arith.addf %15, %16 : vector<2x8x8x256xf32>
    %cst = arith.constant 0.111111112 : f32
    %18 = vector.broadcast %cst : f32 to vector<2x8x8x256xf32>
    %19 = arith.mulf %17, %18 : vector<2x8x8x256xf32>
    %cst_3 = arith.constant dense<0xFF800000> : vector<2x8x256xf32>
    %20 = vector.multi_reduction <maximumf>, %19, %cst_3 [2] : vector<2x8x8x256xf32> to vector<2x8x256xf32>
    %c0_4 = arith.constant 0 : index
    %c0_5 = arith.constant 0 : index
    %c0_6 = arith.constant 0 : index
    %21 = vector.load %arg2[%c0_4, %c0_5, %c0_6] : memref<2x8x256xf32, #tpu.memory_space<vmem>>, vector<2x8x256xf32>
    tpu.vector_store %arg2[%c0_4, %c0_5, %c0_6], %20 {strides = array<i32>} : memref<2x8x256xf32, #tpu.memory_space<vmem>>, vector<2x8x256xf32>,
    return
  }
  func.func @transform_0(%arg0: i32) -> (i32, i32, i32, i32) {
    %c0_i32 = arith.constant 0 : i32
    %c0_i32_0 = arith.constant 0 : i32
    %c0_i32_1 = arith.constant 0 : i32
    %c0_i32_2 = arith.constant 0 : i32
    return %c0_i32, %c0_i32_0, %c0_i32_1, %arg0 : i32, i32, i32, i32
  }
  func.func @transform_1(%arg0: i32) -> (i32, i32, i32) {
    %c0_i32 = arith.constant 0 : i32
    %c0_i32_0 = arith.constant 0 : i32
    %c0_i32_1 = arith.constant 0 : i32
    return %c0_i32, %c0_i32_0, %arg0 : i32, i32, i32
  }
}

</mosaic_0001>

<bundles_post_ra>
// kernel: horizontal_max_pool.1
= control target key start
LH: loop header
LB: loop body
LE: loop exit
PB: predicated region body
PF: predicated region fallthrough
CT: control target
= control target key end

     0   :  { %6 = vsyncpa [#allocation3], 0  ;;  %s671_s6 = smov [#allocation2]   ;;  %s1265_s0 = inlined_call_operand.hbm [shape: f32[2,16,8,256], index: 0, kind: input, shape index: {}]   ;;  %s1266_s1 = inlined_call_operand.vmem [shape: f32[2,8,256], index: 1, kind: output, shape index: {}]  }
   0x1   :  { %s12_s7 = sshll.u32 %s671_s6, 4  ;;  %s13_s7 = int_to_ptr.vmem [resolvable:$true] %s12_s7 }
   0x2   :  { %s657_s8 = scalar_lea.vmem %s13_s7, 8192  ;;  %p662_p1 = scmp.lt.s32.totalorder %s13_s7, %s13_s7 }
   0x3   :  { %p658_p0 = scmp.ne.s32.totalorder %s13_s7, %s657_s8  ;;  %p663_p2 = scmp.lt.s32.totalorder %s657_s8, %s657_s8 }
   0x5   :  { %p664_p3 = por %p663_p2, %p662_p1 }
   0x7   :  { %p665_p4 = pnand %p664_p3, %p658_p0 }
   0x9   :  { %668 = shalt.err (!%p665_p4)
}
   0xa   :  { %s672_s9 = smov 256   ;;  %s673_s10 = smov 16  }
   0xb   :  { %18 = dma.hbm_to_vmem [thread:$0]  %s1265_s0, 8192, %s13_s7, [#allocation3], %s672_s9, %s672_s9, %s673_s10  }
   0xc   :  { %669 = dma.done.wait [#allocation3], 8192  }
   0xd   :  { %670 = vsyncadd [#allocation3], 4294959104  ;;  %v22_v0 = vld [vmem:[#allocation2] sm:$0xff]  ;;  %v23_v1 = vld [vmem:[#allocation2 + $0x8] sm:$0xff]  ;;  %vm598_vm0 = vcmask 1041409   ;;  %vm600_vm1 = vcmask 1042434  }
   0xe   :  { %v24_v2 = vld [vmem:[#allocation2 + $0x10] sm:$0xff]  ;;  %v25_v3 = vld [vmem:[#allocation2 + $0x18] sm:$0xff]  ;;  %v26_v4 = vld [vmem:[#allocation2 + $0x20] sm:$0xff]  ;;  %vm602_vm2 = vcmask 1043459   ;;  %vm604_vm3 = vcmask 1044484   ;;  %vm606_vm4 = vcmask 1045509  }
   0xf   :  { %v27_v5 = vld [vmem:[#allocation2 + $0x28] sm:$0xff]  ;;  %v28_v6 = vld [vmem:[#allocation2 + $0x30] sm:$0xff]  ;;  %v29_v7 = vld [vmem:[#allocation2 + $0x38] sm:$0xff]  ;;  %v86_v12 = vadd.f32 %v24_v2, %v22_v0  ;;  %v87_v16 = vadd.f32 %v25_v3, %v23_v1  ;;  %v88_v17 = vadd.f32 %v26_v4, %v24_v2  ;;  %vm608_vm5 = vcmask 1046534  }
  0x10   :  { %v687_v8 = vld [vmem:[#allocation2 + $0x40] sm:$0xff]  ;;  %v689_v9 = vld [vmem:[#allocation2 + $0x48] sm:$0xff]  ;;  %v691_v10 = vld [vmem:[#allocation2 + $0x50] sm:$0xff]  ;;  %v89_v18 = vadd.f32 %v27_v5, %v25_v3  ;;  %v90_v19 = vadd.f32 %v28_v6, %v26_v4  ;;  %v91_v23 = vadd.f32 %v29_v7, %v27_v5  ;;  %vm610_vm6 = vcmask 1047559  }
  0x11   :  { %1335 = vst [vmem:[#allocation5_spill] sm:$0xff] %v691_v10  ;;  %v693_v11 = vld [vmem:[#allocation2 + $0x58] sm:$0xff]  ;;  %v695_v13 = vld [vmem:[#allocation2 + $0x60] sm:$0xff]  ;;  %v697_v14 = vld [vmem:[#allocation2 + $0x68] sm:$0xff]  ;;  %v92_v24 = vadd.f32 %v687_v8, %v28_v6  ;;  %v93_v25 = vadd.f32 %v689_v9, %v29_v7  ;;  %v94_v26 = vadd.f32 %v691_v10, %v687_v8  ;;  %v118_v34 = vadd.f32 %v86_v12, %v26_v4 }
  0x12   :  { %1336 = vst [vmem:[#allocation6_spill] sm:$0xff] %v693_v11  ;;  %1337 = vst [vmem:[#allocation7_spill] sm:$0xff] %v695_v13  ;;  %v699_v15 = vld [vmem:[#allocation2 + $0x70] sm:$0xff]  ;;  %v701_v20 = vld [vmem:[#allocation2 + $0x78] sm:$0xff]  ;;  %v95_v27 = vadd.f32 %v693_v11, %v689_v9  ;;  %v96_v28 = vadd.f32 %v695_v13, %v691_v10  ;;  %v97_v29 = vadd.f32 %v697_v14, %v693_v11 }
  0x13   :  { %1338 = vst [vmem:[#allocation8_spill] sm:$0xff] %v699_v15  ;;  %1339 = vst [vmem:[#allocation9_spill] sm:$0xff] %v701_v20  ;;  %v703_v21 = vld [vmem:[#allocation2 + $0x80] sm:$0xff]  ;;  %v705_v22 = vld [vmem:[#allocation2 + $0x88] sm:$0xff]  ;;  %v98_v30 = vadd.f32 %v699_v15, %v695_v13  ;;  %v99_v31 = vadd.f32 %v701_v20, %v697_v14  ;;  %v119_v37 = vadd.f32 %v87_v16, %v27_v5 }
  0x14   :  { %1340 = vst [vmem:[#allocation10_spill] sm:$0xff] %v703_v21  ;;  %1341 = vst [vmem:[#allocation11_spill] sm:$0xff] %v705_v22  ;;  %v100_v32 = vadd.f32 %v703_v21, %v699_v15  ;;  %v101_v33 = vadd.f32 %v705_v22, %v701_v20  ;;  %v725_v35 = vld [vmem:[#allocation2 + $0x90] sm:$0xff]  ;;  %v727_v36 = vld [vmem:[#allocation2 + $0x98] sm:$0xff]  ;;  %v120_v38 = vadd.f32 %v88_v17, %v28_v6 }
  0x15   :  { %1342 = vst [vmem:[#allocation12_spill] sm:$0xff] %v725_v35  ;;  %1343 = vst [vmem:[#allocation13_spill] sm:$0xff] %v727_v36  ;;  %v121_v39 = vadd.f32 %v89_v18, %v29_v7  ;;  %v122_v40 = vadd.f32 %v90_v19, %v687_v8  ;;  %v123_v41 = vadd.f32 %v91_v23, %v689_v9  ;;  %v54_v45 = vld [vmem:[#allocation2 + $0x100] sm:$0xff]  ;;  %v55_v50 = vld [vmem:[#allocation2 + $0x108] sm:$0xff] }
  0x16   :  { %v124_v42 = vadd.f32 %v92_v24, %v691_v10  ;;  %v125_v43 = vadd.f32 %v93_v25, %v693_v11  ;;  %v126_v44 = vadd.f32 %v94_v26, %v695_v13  ;;  %v127_v46 = vadd.f32 %v95_v27, %v697_v14  ;;  %v56_v51 = vld [vmem:[#allocation2 + $0x110] sm:$0xff]  ;;  %v57_v52 = vld [vmem:[#allocation2 + $0x118] sm:$0xff]  ;;  %v58_v57 = vld [vmem:[#allocation2 + $0x120] sm:$0xff] }
  0x17   :  { %v128_v47 = vadd.f32 %v96_v28, %v699_v15  ;;  %v737_v48 = vadd.f32 %v97_v29, %v701_v20  ;;  %v740_v49 = vadd.f32 %v98_v30, %v703_v21  ;;  %v743_v53 = vadd.f32 %v99_v31, %v705_v22  ;;  %v59_v58 = vld [vmem:[#allocation2 + $0x128] sm:$0xff]  ;;  %v753_v59 = vld [vmem:[#allocation2 + $0x130] sm:$0xff]  ;;  %v61_v0 = vld [vmem:[#allocation2 + $0x138] sm:$0xff] }
  0x18   :  { %v746_v54 = vadd.f32 %v100_v32, %v725_v35  ;;  %v749_v55 = vadd.f32 %v101_v33, %v727_v36  ;;  %v751_v56 = vadd.f32 %v118_v34, %v28_v6  ;;  %v755_v60 = vadd.f32 %v119_v37, %v29_v7  ;;  %v766_v1 = vld [vmem:[#allocation2 + $0x140] sm:$0xff]  ;;  %v768_v2 = vld [vmem:[#allocation2 + $0x148] sm:$0xff]  ;;  %v779_v7 = vld [vmem:[#allocation2 + $0x150] sm:$0xff] }
  0x19   :  { %v758_v61 = vadd.f32 %v120_v38, %v687_v8  ;;  %v761_v62 = vadd.f32 %v121_v39, %v689_v9  ;;  %v764_v63 = vadd.f32 %v122_v40, %v691_v10  ;;  %v102_v3 = vadd.f32 %v56_v51, %v54_v45  ;;  %v781_v12 = vld [vmem:[#allocation2 + $0x158] sm:$0xff]  ;;  %v783_v16 = vld [vmem:[#allocation2 + $0x160] sm:$0xff]  ;;  %v791_v24 = vld [vmem:[#allocation2 + $0x168] sm:$0xff] }
  0x1a   :  { %v771_v4 = vadd.f32 %v123_v41, %v693_v11  ;;  %v774_v5 = vadd.f32 %v124_v42, %v695_v13  ;;  %v777_v6 = vadd.f32 %v125_v43, %v697_v14  ;;  %v103_v17 = vadd.f32 %v57_v52, %v55_v50  ;;  %1347 = vst [vmem:[#allocation17_spill] sm:$0xff] %v791_v24  ;;  %v793_v25 = vld [vmem:[#allocation2 + $0x170] sm:$0xff]  ;;  %v795_v26 = vld [vmem:[#allocation2 + $0x178] sm:$0xff]  ;;  %v801_v31 = vld [vmem:[#allocation2 + $0x180] sm:$0xff] }
  0x1b   :  { %v104_v18 = vadd.f32 %v58_v57, %v56_v51  ;;  %v786_v19 = vadd.f32 %v126_v44, %v699_v15  ;;  %v789_v23 = vadd.f32 %v127_v46, %v701_v20  ;;  %1348 = vst [vmem:[#allocation18_spill] sm:$0xff] %v793_v25  ;;  %v105_v27 = vadd.f32 %v59_v58, %v57_v52  ;;  %v803_v32 = vld [vmem:[#allocation2 + $0x188] sm:$0xff]  ;;  %v826_v50 = vld [vmem:[#allocation2 + $0x198] sm:$0xff] }
  0x1c   :  { %1344 = vst [vmem:[#allocation14_spill] sm:$0xff] %v777_v6  ;;  %v106_v28 = vadd.f32 %v753_v59, %v58_v57  ;;  %v107_v29 = vadd.f32 %v61_v0, %v59_v58  ;;  %v799_v30 = vadd.f32 %v128_v47, %v703_v21  ;;  %1350 = vst [vmem:[#allocation20_spill] sm:$0xff] %v801_v31  ;;  %v824_v47 = vld [vmem:[#allocation2 + $0x190] sm:$0xff]  ;;  %v833_v21 = vld [vmem:[#allocation2 + $0xa8] sm:$0xff] }
  0x1d   :  { %1345 = vst [vmem:[#allocation15_spill] sm:$0xff] %v786_v19  ;;  %1346 = vst [vmem:[#allocation16_spill] sm:$0xff] %v789_v23  ;;  %v108_v33 = vadd.f32 %v766_v1, %v753_v59  ;;  %v109_v34 = vadd.f32 %v768_v2, %v61_v0  ;;  %v110_v37 = vadd.f32 %v779_v7, %v766_v1  ;;  %v831_v19 = vld [vmem:[#allocation2 + $0xa0] sm:$0xff] }
  0x1e   :  { %1349 = vst [vmem:[#allocation19_spill] sm:$0xff] %v799_v30  ;;  %1351 = vst [vmem:[#allocation21_spill] sm:$0xff] %v803_v32  ;;  %v111_v38 = vadd.f32 %v781_v12, %v768_v2  ;;  %v112_v39 = vadd.f32 %v783_v16, %v779_v7  ;;  %v113_v40 = vadd.f32 %v791_v24, %v781_v12 }
  0x1f   :  { %v114_v41 = vadd.f32 %v793_v25, %v783_v16  ;;  %v115_v42 = vadd.f32 %v795_v26, %v791_v24  ;;  %v116_v43 = vadd.f32 %v801_v31, %v793_v25  ;;  %v117_v44 = vadd.f32 %v803_v32, %v795_v26  ;;  %1352 = vst [vmem:[#allocation22_spill] sm:$0xff] %v824_v47 }
  0x20   :  { %v134_v45 = vadd.f32 %v102_v3, %v58_v57  ;;  %v135_v46 = vadd.f32 %v103_v17, %v59_v58  ;;  %1353 = vst [vmem:[#allocation23_spill] sm:$0xff] %v826_v50  ;;  %v136_v51 = vadd.f32 %v104_v18, %v753_v59  ;;  %v137_v52 = vadd.f32 %v105_v27, %v61_v0 }
  0x21   :  { %v138_v30 = vadd.f32 %v106_v28, %v766_v1  ;;  %v139_v23 = vadd.f32 %v107_v29, %v768_v2  ;;  %1354 = vst [vmem:[#allocation24_spill] sm:$0xff] %v831_v19  ;;  %1355 = vst [vmem:[#allocation25_spill] sm:$0xff] %v833_v21  ;;  %v140_v6 = vadd.f32 %v108_v33, %v779_v7 }
  0x22   :  { %v141_v57 = vadd.f32 %v109_v34, %v781_v12  ;;  %v142_v58 = vadd.f32 %v110_v37, %v783_v16  ;;  %v143_v3 = vadd.f32 %v111_v38, %v791_v24  ;;  %v144_v17 = vadd.f32 %v112_v39, %v793_v25 }
  0x23   :  { %v145_v18 = vadd.f32 %v113_v40, %v795_v26  ;;  %v146_v27 = vadd.f32 %v114_v41, %v801_v31  ;;  %v147_v28 = vadd.f32 %v115_v42, %v803_v32  ;;  %v148_v29 = vadd.f32 %v116_v43, %v824_v47  ;;  %v856_v41 = vld [vmem:[#allocation2 + $0x1a0] sm:$0xff]  ;;  %v858_v42 = vld [vmem:[#allocation2 + $0x1a8] sm:$0xff] }
  0x24   :  { %v149_v20 = vadd.f32 %v117_v44, %v826_v50  ;;  %v161_v33 = vadd.f32 %v737_v48, %v705_v22  ;;  %v162_v34 = vadd.f32 %v740_v49, %v725_v35  ;;  %v163_v37 = vadd.f32 %v743_v53, %v727_v36  ;;  %1356 = vst [vmem:[#allocation26_spill] sm:$0xff] %v856_v41 }
  0x25   :  { %v164_v38 = vadd.f32 %v746_v54, %v831_v19  ;;  %v165_v39 = vadd.f32 %v749_v55, %v833_v21  ;;  %v166_v40 = vadd.f32 %v134_v45, %v753_v59  ;;  %1357 = vst [vmem:[#allocation27_spill] sm:$0xff] %v858_v42  ;;  %v167_v43 = vadd.f32 %v135_v46, %v61_v0 }
  0x26   :  { %v168_v48 = vadd.f32 %v136_v51, %v766_v1  ;;  %v169_v49 = vadd.f32 %v137_v52, %v768_v2  ;;  %v170_v44 = vadd.f32 %v138_v30, %v779_v7  ;;  %v171_v53 = vadd.f32 %v139_v23, %v781_v12  ;;  %v876_v52 = vld [vmem:[#allocation2 + $0xb0] sm:$0xff] }
  0x27   :  { %v172_v54 = vadd.f32 %v140_v6, %v783_v16  ;;  %v173_v19 = vadd.f32 %v141_v57, %v791_v24  ;;  %v174_v55 = vadd.f32 %v142_v58, %v793_v25  ;;  %v175_v59 = vadd.f32 %v143_v3, %v795_v26  ;;  %1358 = vst [vmem:[#allocation28_spill] sm:$0xff] %v876_v52  ;;  %v878_v57 = vld [vmem:[#allocation2 + $0xb8] sm:$0xff] }
  0x28   :  { %v176_v45 = vadd.f32 %v144_v17, %v801_v31  ;;  %v177_v0 = vadd.f32 %v145_v18, %v803_v32  ;;  %v178_v46 = vadd.f32 %v146_v27, %v824_v47  ;;  %v179_v51 = vadd.f32 %v147_v28, %v826_v50  ;;  %1359 = vst [vmem:[#allocation29_spill] sm:$0xff] %v878_v57  ;;  %v1361_v27 = vld [vmem:[#allocation14_spill] sm:$0xff] }
  0x29   :  { %v180_v30 = vadd.f32 %v148_v29, %v856_v41  ;;  %v181_v23 = vadd.f32 %v149_v20, %v858_v42  ;;  %v182_v6 = vadd.f32 %v751_v56, %v687_v8  ;;  %v183_v58 = vadd.f32 %v755_v60, %v689_v9  ;;  %v1360_v56 = vld [vmem:[#allocation9_spill] sm:$0xff]  ;;  %v1362_v29 = vld [vmem:[#allocation10_spill] sm:$0xff]  ;;  %v1363_v9 = vld [vmem:[#allocation15_spill] sm:$0xff] }
  0x2a   :  { %v184_v3 = vadd.f32 %v758_v61, %v691_v10  ;;  %v185_v17 = vadd.f32 %v761_v62, %v693_v11  ;;  %v186_v18 = vadd.f32 %v764_v63, %v695_v13  ;;  %v187_v20 = vadd.f32 %v771_v4, %v697_v14  ;;  %v1364_v61 = vld [vmem:[#allocation16_spill] sm:$0xff]  ;;  %v1365_v62 = vld [vmem:[#allocation19_spill] sm:$0xff] }
  0x2b   :  { %v188_v8 = vadd.f32 %v774_v5, %v699_v15  ;;  %v189_v28 = vadd.f32 %v1361_v27, %v1360_v56  ;;  %v190_v60 = vadd.f32 %v1363_v9, %v1362_v29  ;;  %v191_v10 = vadd.f32 %v1364_v61, %v705_v22  ;;  %v1366_v13 = vld [vmem:[#allocation24_spill] sm:$0xff]  ;;  %v906_v56 = vld [vmem:[#allocation2 + $0x1b0] sm:$0xff] }
  0x2c   :  { %v192_v11 = vadd.f32 %v1365_v62, %v725_v35  ;;  %v193_v63 = vadd.f32 %v161_v33, %v727_v36  ;;  %v194_v42 = vadd.f32 %v162_v34, %v1366_v13  ;;  %v195_v4 = vadd.f32 %v163_v37, %v833_v21  ;;  %1367 = vst [vmem:[#allocation14_spill] sm:$0xff] %v906_v56  ;;  %v908_v9 = vld [vmem:[#allocation2 + $0x1b8] sm:$0xff] }
  0x2d   :  { %v196_v5 = vadd.f32 %v164_v38, %v876_v52  ;;  %v197_v15 = vadd.f32 %v165_v39, %v878_v57  ;;  %v198_v27 = vadd.f32 %v166_v40, %v766_v1  ;;  %1368 = vst [vmem:[#allocation15_spill] sm:$0xff] %v908_v9  ;;  %v199_v61 = vadd.f32 %v167_v43, %v768_v2 }
  0x2e   :  { %v200_v62 = vadd.f32 %v168_v48, %v779_v7  ;;  %v201_v33 = vadd.f32 %v169_v49, %v781_v12  ;;  %v202_v34 = vadd.f32 %v170_v44, %v783_v16  ;;  %v203_v37 = vadd.f32 %v171_v53, %v791_v24  ;;  %v1369_v48 = vld [vmem:[#allocation27_spill] sm:$0xff]  ;;  %v1370_v24 = vld [vmem:[#allocation5_spill] sm:$0xff] }
  0x2f   :  { %v204_v38 = vadd.f32 %v172_v54, %v793_v25  ;;  %v205_v39 = vadd.f32 %v173_v19, %v795_v26  ;;  %v206_v1 = vadd.f32 %v174_v55, %v801_v31  ;;  %v207_v40 = vadd.f32 %v175_v59, %v803_v32  ;;  %v926_v25 = vld [vmem:[#allocation2 + $0xc0] sm:$0xff]  ;;  %v928_v19 = vld [vmem:[#allocation2 + $0xc8] sm:$0xff]  ;;  %v1374_v32 = vld [vmem:[#allocation7_spill] sm:$0xff] }
  0x30   :  { %v208_v57 = vadd.f32 %v176_v45, %v824_v47  ;;  %v209_v2 = vadd.f32 %v177_v0, %v826_v50  ;;  %v210_v43 = vadd.f32 %v178_v46, %v856_v41  ;;  %v211_v49 = vadd.f32 %v179_v51, %v1369_v48  ;;  %1371 = vst [vmem:[#allocation16_spill] sm:$0xff] %v926_v25  ;;  %v1373_v55 = vld [vmem:[#allocation6_spill] sm:$0xff]  ;;  %v1375_v50 = vld [vmem:[#allocation8_spill] sm:$0xff]  ;;  %v1376_v41 = vld [vmem:[#allocation9_spill] sm:$0xff] }
  0x31   :  { %v212_v44 = vadd.f32 %v180_v30, %v906_v56  ;;  %v213_v53 = vadd.f32 %v181_v23, %v908_v9  ;;  %v214_v54 = vadd.f32 %v182_v6, %v1370_v24  ;;  %1372 = vst [vmem:[#allocation19_spill] sm:$0xff] %v928_v19  ;;  %v215_v59 = vadd.f32 %v183_v58, %v1373_v55  ;;  %v1377_v55 = vld [vmem:[#allocation29_spill] sm:$0xff] }
  0x32   :  { %v216_v45 = vadd.f32 %v184_v3, %v1374_v32  ;;  %v217_v0 = vadd.f32 %v185_v17, %v697_v14  ;;  %v218_v46 = vadd.f32 %v186_v18, %v1375_v50  ;;  %v219_v51 = vadd.f32 %v187_v20, %v1376_v41 }
  0x33   :  { %v220_v30 = vadd.f32 %v188_v8, %v1362_v29  ;;  %v221_v23 = vadd.f32 %v189_v28, %v705_v22  ;;  %v222_v24 = vadd.f32 %v190_v60, %v725_v35  ;;  %v223_v6 = vadd.f32 %v191_v10, %v727_v36  ;;  %v946_v29 = vld [vmem:[#allocation2 + $0x1c0] sm:$0xff]  ;;  %v948_v28 = vld [vmem:[#allocation2 + $0x1c8] sm:$0xff] }
  0x34   :  { %v224_v9 = vadd.f32 %v192_v11, %v1366_v13  ;;  %v225_v58 = vadd.f32 %v193_v63, %v833_v21  ;;  %v226_v3 = vadd.f32 %v194_v42, %v876_v52  ;;  %v227_v17 = vadd.f32 %v195_v4, %v1377_v55  ;;  %1378 = vst [vmem:[#allocation24_spill] sm:$0xff] %v946_v29  ;;  %v1380_v60 = vld [vmem:[#allocation17_spill] sm:$0xff]  ;;  %v1381_v21 = vld [vmem:[#allocation18_spill] sm:$0xff] }
  0x35   :  { %v228_v18 = vadd.f32 %v196_v5, %v926_v25  ;;  %v229_v20 = vadd.f32 %v197_v15, %v928_v19  ;;  %v230_v8 = vadd.f32 %v198_v27, %v779_v7  ;;  %1379 = vst [vmem:[#allocation5_spill] sm:$0xff] %v948_v28  ;;  %v231_v10 = vadd.f32 %v199_v61, %v781_v12  ;;  %v1382_v25 = vld [vmem:[#allocation21_spill] sm:$0xff]  ;;  %v1383_v27 = vld [vmem:[#allocation23_spill] sm:$0xff]  ;;  %v1384_v55 = vld [vmem:[#allocation26_spill] sm:$0xff] }
  0x36   :  { %v232_v11 = vadd.f32 %v200_v62, %v783_v16  ;;  %v233_v63 = vadd.f32 %v201_v33, %v1380_v60  ;;  %v234_v42 = vadd.f32 %v202_v34, %v1381_v21  ;;  %v235_v4 = vadd.f32 %v203_v37, %v795_v26  ;;  %v1385_v62 = vld [vmem:[#allocation15_spill] sm:$0xff] }
  0x37   :  { %v236_v5 = vadd.f32 %v204_v38, %v801_v31  ;;  %v237_v15 = vadd.f32 %v205_v39, %v1382_v25  ;;  %v238_v7 = vadd.f32 %v206_v1, %v824_v47  ;;  %v239_v19 = vadd.f32 %v207_v40, %v1383_v27  ;;  %v966_v31 = vld [vmem:[#allocation2 + $0xd0] sm:$0xff]  ;;  %v968_v39 = vld [vmem:[#allocation2 + $0xd8] sm:$0xff] }
  0x38   :  { %v240_v52 = vadd.f32 %v208_v57, %v1384_v55  ;;  %v241_v12 = vadd.f32 %v209_v2, %v1369_v48  ;;  %v242_v61 = vadd.f32 %v210_v43, %v906_v56  ;;  %v243_v33 = vadd.f32 %v211_v49, %v1385_v62  ;;  %1386 = vst [vmem:[#allocation6_spill] sm:$0xff] %v966_v31  ;;  %v1388_v2 = vld [vmem:[#allocation10_spill] sm:$0xff]  ;;  %v1391_v56 = vld [vmem:[#allocation29_spill] sm:$0xff] }
  0x39   :  { %v244_v34 = vadd.f32 %v212_v44, %v946_v29  ;;  %v245_v37 = vadd.f32 %v213_v53, %v948_v28  ;;  %v246_v38 = vadd.f32 %v214_v54, %v1374_v32  ;;  %1387 = vst [vmem:[#allocation7_spill] sm:$0xff] %v968_v39  ;;  %v247_v1 = vadd.f32 %v215_v59, %v697_v14  ;;  %v1389_v54 = vld [vmem:[#allocation25_spill] sm:$0xff]  ;;  %v1390_v29 = vld [vmem:[#allocation28_spill] sm:$0xff] }
  0x3a   :  { %v248_v57 = vadd.f32 %v216_v45, %v1375_v50  ;;  %v249_v40 = vadd.f32 %v217_v0, %v1376_v41  ;;  %v250_v43 = vadd.f32 %v218_v46, %v1388_v2  ;;  %v251_v49 = vadd.f32 %v219_v51, %v705_v22  ;;  %v1392_v59 = vld [vmem:[#allocation16_spill] sm:$0xff]  ;;  %v1393_v50 = vld [vmem:[#allocation19_spill] sm:$0xff] }
  0x3b   :  { %v252_v44 = vadd.f32 %v220_v30, %v725_v35  ;;  %v253_v53 = vadd.f32 %v221_v23, %v727_v36  ;;  %v254_v32 = vadd.f32 %v222_v24, %v1366_v13  ;;  %v255_v28 = vadd.f32 %v223_v6, %v1389_v54  ;;  %v986_v35 = vld [vmem:[#allocation2 + $0x1d0] sm:$0xff]  ;;  %v988_v23 = vld [vmem:[#allocation2 + $0x1d8] sm:$0xff] }
  0x3c   :  { %v256_v62 = vadd.f32 %v224_v9, %v1390_v29  ;;  %v257_v14 = vadd.f32 %v225_v58, %v1391_v56  ;;  %v258_v45 = vadd.f32 %v226_v3, %v1392_v59  ;;  %v259_v0 = vadd.f32 %v227_v17, %v1393_v50  ;;  %1394 = vst [vmem:[#allocation9_spill] sm:$0xff] %v986_v35  ;;  %v1396_v58 = vld [vmem:[#allocation20_spill] sm:$0xff]  ;;  %v1398_v50 = vld [vmem:[#allocation15_spill] sm:$0xff] }
  0x3d   :  { %v260_v46 = vadd.f32 %v228_v18, %v966_v31  ;;  %v261_v51 = vadd.f32 %v229_v20, %v968_v39  ;;  %v262_v30 = vadd.f32 %v230_v8, %v783_v16  ;;  %1395 = vst [vmem:[#allocation17_spill] sm:$0xff] %v988_v23  ;;  %v263_v24 = vadd.f32 %v231_v10, %v1380_v60  ;;  %v1397_v39 = vld [vmem:[#allocation14_spill] sm:$0xff]  ;;  %v1399_v60 = vld [vmem:[#allocation24_spill] sm:$0xff] }
  0x3e   :  { %v264_v9 = vadd.f32 %v232_v11, %v1381_v21  ;;  %v265_v6 = vadd.f32 %v233_v63, %v795_v26  ;;  %v266_v3 = vadd.f32 %v234_v42, %v1396_v58  ;;  %v267_v17 = vadd.f32 %v235_v4, %v1382_v25  ;;  %v1400_v21 = vld [vmem:[#allocation5_spill] sm:$0xff]  ;;  %v1401_v25 = vld [vmem:[#allocation8_spill] sm:$0xff] }
  0x3f   :  { %v268_v18 = vadd.f32 %v236_v5, %v824_v47  ;;  %v269_v20 = vadd.f32 %v237_v15, %v1383_v27  ;;  %v270_v16 = vadd.f32 %v238_v7, %v1384_v55  ;;  %v271_v8 = vadd.f32 %v239_v19, %v1369_v48  ;;  %v50_v47 = vld [vmem:[#allocation2 + $0xe0] sm:$0xff]  ;;  %v51_v15 = vld [vmem:[#allocation2 + $0xe8] sm:$0xff] }
  0x40   :  { %v272_v31 = vadd.f32 %v240_v52, %v1397_v39  ;;  %v273_v10 = vadd.f32 %v241_v12, %v1398_v50  ;;  %v274_v11 = vadd.f32 %v242_v61, %v1399_v60  ;;  %v275_v63 = vadd.f32 %v243_v33, %v1400_v21  ;;  %v1402_v39 = vld [vmem:[#allocation12_spill] sm:$0xff] }
  0x41   :  { %v276_v42 = vadd.f32 %v244_v34, %v986_v35  ;;  %v277_v4 = vadd.f32 %v245_v37, %v988_v23  ;;  %v278_v5 = vadd.f32 %v246_v38, %v1401_v25  ;;  %v279_v7 = vadd.f32 %v247_v1, %v1376_v41  ;;  %v1403_v23 = vld [vmem:[#allocation19_spill] sm:$0xff]  ;;  %v1404_v1 = vld [vmem:[#allocation6_spill] sm:$0xff] }
  0x42   :  { %v280_v19 = vadd.f32 %v248_v57, %v1388_v2  ;;  %v281_v52 = vadd.f32 %v249_v40, %v705_v22  ;;  %v282_v12 = vadd.f32 %v250_v43, %v1402_v39  ;;  %v283_v61 = vadd.f32 %v251_v49, %v727_v36  ;;  %v1405_v2 = vld [vmem:[#allocation7_spill] sm:$0xff]  ;;  %v1406_v39 = vld [vmem:[#allocation18_spill] sm:$0xff]  ;;  %v82_v36 = vld [vmem:[#allocation2 + $0x1e0] sm:$0xff] }
  0x43   :  { %v284_v33 = vadd.f32 %v252_v44, %v1366_v13  ;;  %v285_v34 = vadd.f32 %v253_v53, %v1389_v54  ;;  %v286_v37 = vadd.f32 %v254_v32, %v1390_v29  ;;  %v287_v25 = vadd.f32 %v255_v28, %v1391_v56  ;;  %v83_v44 = vld [vmem:[#allocation2 + $0x1e8] sm:$0xff]  ;;  %v1407_v29 = vld [vmem:[#allocation21_spill] sm:$0xff] }
  0x44   :  { %v288_v38 = vadd.f32 %v256_v62, %v1392_v59  ;;  %v289_v41 = vadd.f32 %v257_v14, %v1403_v23  ;;  %v290_v57 = vadd.f32 %v258_v45, %v1404_v1  ;;  %v291_v40 = vadd.f32 %v259_v0, %v1405_v2  ;;  %v1408_v56 = vld [vmem:[#allocation22_spill] sm:$0xff] }
  0x45   :  { %v292_v22 = vadd.f32 %v260_v46, %v50_v47  ;;  %v293_v43 = vadd.f32 %v261_v51, %v51_v15  ;;  %v294_v49 = vadd.f32 %v262_v30, %v1406_v39  ;;  %v295_v53 = vadd.f32 %v263_v24, %v795_v26  ;;  %v1409_v46 = vld [vmem:[#allocation14_spill] sm:$0xff] }
  0x46   :  { %v296_v32 = vadd.f32 %v264_v9, %v1396_v58  ;;  %v297_v28 = vadd.f32 %v265_v6, %v1407_v29  ;;  %v298_v62 = vadd.f32 %v266_v3, %v1408_v56  ;;  %v299_v14 = vadd.f32 %v267_v17, %v1383_v27  ;;  %v1410_v9 = vld [vmem:[#allocation17_spill] sm:$0xff]  ;;  %v1411_v56 = vld [vmem:[#allocation10_spill] sm:$0xff]  ;;  %v52_v27 = vld [vmem:[#allocation2 + $0xf0] sm:$0xff] }
  0x47   :  { %v300_v45 = vadd.f32 %v268_v18, %v1384_v55  ;;  %v301_v0 = vadd.f32 %v269_v20, %v1369_v48  ;;  %v302_v51 = vadd.f32 %v270_v16, %v1409_v46  ;;  %v303_v39 = vadd.f32 %v271_v8, %v1398_v50  ;;  %v53_v18 = vld [vmem:[#allocation2 + $0xf8] sm:$0xff]  ;;  %v1412_v55 = vld [vmem:[#allocation11_spill] sm:$0xff]  ;;  %v1414_v46 = vld [vmem:[#allocation13_spill] sm:$0xff] }
  0x48   :  { %v304_v30 = vadd.f32 %v272_v31, %v1399_v60  ;;  %v305_v26 = vadd.f32 %v273_v10, %v1400_v21  ;;  %v306_v24 = vadd.f32 %v274_v11, %v986_v35  ;;  %v307_v6 = vadd.f32 %v275_v63, %v1410_v9  ;;  %v1413_v48 = vld [vmem:[#allocation12_spill] sm:$0xff]  ;;  %v1416_v35 = vld [vmem:[#allocation29_spill] sm:$0xff] }
  0x49   :  { %v308_v29 = vadd.f32 %v276_v42, %v82_v36  ;;  %v309_v3 = vadd.f32 %v277_v4, %v83_v44  ;;  %v310_v17 = vadd.f32 %v278_v5, %v1411_v56  ;;  %v311_v20 = vadd.f32 %v279_v7, %v1412_v55  ;;  %v1415_v21 = vld [vmem:[#allocation28_spill] sm:$0xff] }
  0x4a   :  { %v312_v16 = vadd.f32 %v280_v19, %v1413_v48  ;;  %v313_v8 = vadd.f32 %v281_v52, %v1414_v46  ;;  %v314_v31 = vadd.f32 %v282_v12, %v1366_v13  ;;  %v315_v10 = vadd.f32 %v283_v61, %v1389_v54  ;;  %v1417_v52 = vld [vmem:[#allocation21_spill] sm:$0xff]  ;;  %v1418_v12 = vld [vmem:[#allocation22_spill] sm:$0xff]  ;;  %v1419_v61 = vld [vmem:[#allocation23_spill] sm:$0xff] }
  0x4b   :  { %v316_v11 = vadd.f32 %v284_v33, %v1415_v21  ;;  %v317_v63 = vadd.f32 %v285_v34, %v1416_v35  ;;  %v318_v42 = vadd.f32 %v286_v37, %v1392_v59  ;;  %v319_v56 = vadd.f32 %v287_v25, %v1403_v23  ;;  %v1420_v33 = vld [vmem:[#allocation26_spill] sm:$0xff]  ;;  %v1421_v34 = vld [vmem:[#allocation27_spill] sm:$0xff] }
  0x4c   :  { %v320_v4 = vadd.f32 %v288_v38, %v1404_v1  ;;  %v321_v55 = vadd.f32 %v289_v41, %v1405_v2  ;;  %v322_v5 = vadd.f32 %v290_v57, %v50_v47  ;;  %v323_v48 = vadd.f32 %v291_v40, %v51_v15  ;;  %v1422_v37 = vld [vmem:[#allocation14_spill] sm:$0xff]  ;;  %v85_v1 = vld [vmem:[#allocation2 + $0x1f8] sm:$0xff]  ;;  %v1424_v57 = vld [vmem:[#allocation9_spill] sm:$0xff] }
  0x4d   :  { %v324_v7 = vadd.f32 %v292_v22, %v52_v27  ;;  %v325_v19 = vadd.f32 %v293_v43, %v53_v18  ;;  %v326_v13 = vadd.f32 %v294_v49, %v1396_v58  ;;  %v327_v54 = vadd.f32 %v295_v53, %v1417_v52  ;;  %v84_v22 = vld [vmem:[#allocation2 + $0x1f0] sm:$0xff]  ;;  %v1423_v27 = vld [vmem:[#allocation5_spill] sm:$0xff] }
  0x4e   :  { %v328_v21 = vadd.f32 %v296_v32, %v1418_v12  ;;  %v329_v35 = vadd.f32 %v297_v28, %v1419_v61  ;;  %v330_v59 = vadd.f32 %v298_v62, %v1420_v33  ;;  %v331_v23 = vadd.f32 %v299_v14, %v1421_v34 }
  0x4f   :  { %v332_v25 = vadd.f32 %v300_v45, %v1422_v37  ;;  %v333_v2 = vadd.f32 %v301_v0, %v1398_v50  ;;  %v334_v47 = vadd.f32 %v302_v51, %v1399_v60  ;;  %v335_v15 = vadd.f32 %v303_v39, %v1423_v27 }
  0x50   :  { %v342_v58 = vmul.f32 0.11111111, %v310_v17  ;;  %v343_v38 = vmul.f32 0.11111111, %v311_v20  ;;  %v344_v41 = vmul.f32 0.11111111, %v312_v16  ;;  %v336_v40 = vadd.f32 %v304_v30, %v1424_v57 }
  0x51   :  { %v345_v43 = vmul.f32 0.11111111, %v313_v8  ;;  %v346_v49 = vmul.f32 0.11111111, %v314_v31  ;;  %v347_v53 = vmul.f32 0.11111111, %v315_v10  ;;  %v337_v32 = vadd.f32 %v305_v26, %v1410_v9 }
  0x52   :  { %v348_v28 = vmul.f32 0.11111111, %v316_v11  ;;  %v349_v62 = vmul.f32 0.11111111, %v317_v63  ;;  %v1057_v14 = vmul.f32 0.11111111, %v318_v42  ;;  %v338_v50 = vadd.f32 %v306_v24, %v82_v36 }
  0x53   :  { %v1059_v60 = vmul.f32 0.11111111, %v319_v56  ;;  %v1061_v45 = vmul.f32 0.11111111, %v320_v4  ;;  %v1063_v0 = vmul.f32 0.11111111, %v321_v55  ;;  %v339_v46 = vadd.f32 %v307_v6, %v83_v44 }
  0x54   :  { %v1065_v51 = vmul.f32 0.11111111, %v322_v5  ;;  %v1067_v39 = vmul.f32 0.11111111, %v323_v48  ;;  %v1069_v30 = vmul.f32 0.11111111, %v324_v7  ;;  %v340_v17 = vadd.f32 %v308_v29, %v84_v22 }
  0x55   :  { %v1071_v26 = vmul.f32 0.11111111, %v325_v19  ;;  %v1073_v9 = vmul.f32 0.11111111, %v326_v13  ;;  %v1075_v18 = vmul.f32 0.11111111, %v327_v54  ;;  %v341_v36 = vadd.f32 %v309_v3, %v85_v1 }
  0x56   :  { %v1077_v24 = vmul.f32 0.11111111, %v328_v21  ;;  %v1079_v20 = vmul.f32 0.11111111, %v329_v35  ;;  %v1081_v16 = vmul.f32 0.11111111, %v330_v59 }
  0x57   :  { %v1083_v44 = vmul.f32 0.11111111, %v331_v23  ;;  %v1085_v6 = vmul.f32 0.11111111, %v332_v25  ;;  %v1087_v8 = vmul.f32 0.11111111, %v333_v2 }
  0x58   :  { %v1089_v29 = vmul.f32 0.11111111, %v334_v47  ;;  %v1091_v31 = vmul.f32 0.11111111, %v335_v15  ;;  %v1093_v10 = vmul.f32 0.11111111, %v336_v40 }
  0x59   :  { %v1095_v11 = vmul.f32 0.11111111, %v337_v32  ;;  %v1097_v3 = vmul.f32 0.11111111, %v338_v50  ;;  %v1099_v63 = vmul.f32 0.11111111, %v339_v46 }
  0x5a   :  { %v1101_v42 = vmul.f32 0.11111111, %v340_v17  ;;  %v1103_v56 = vmul.f32 0.11111111, %v341_v36  ;;  %v374_v4 = vrot.slane %v342_v58, 4  ;;  %v380_v55 = vrot.slane %v343_v38, 4 }
  0x5b   :  { %v386_v5 = vrot.slane %v344_v41, 4  ;;  %v392_v48 = vrot.slane %v345_v43, 4  ;;  %v398_v7 = vrot.slane %v346_v49, 4  ;;  %v404_v19 = vrot.slane %v347_v53, 4 }
  0x5c   :  { %v375_v13 = vmax.f32 %v342_v58, %v374_v4  ;;  %v381_v52 = vmax.f32 %v343_v38, %v380_v55  ;;  %v410_v54 = vrot.slane %v348_v28, 4  ;;  %v416_v12 = vrot.slane %v349_v62, 4 }
  0x5d   :  { %v387_v21 = vmax.f32 %v344_v41, %v386_v5  ;;  %v393_v61 = vmax.f32 %v345_v43, %v392_v48  ;;  %v399_v35 = vmax.f32 %v346_v49, %v398_v7  ;;  %v405_v33 = vmax.f32 %v347_v53, %v404_v19 }
  0x5e   :  { %v376_v59 = vrot.slane %v375_v13, 2  ;;  %v382_v34 = vrot.slane %v381_v52, 2  ;;  %v411_v23 = vmax.f32 %v348_v28, %v410_v54  ;;  %v417_v37 = vmax.f32 %v349_v62, %v416_v12 }
  0x5f   :  { %v388_v25 = vrot.slane %v387_v21, 2  ;;  %v394_v2 = vrot.slane %v393_v61, 2  ;;  %v400_v47 = vrot.slane %v399_v35, 2  ;;  %v406_v22 = vrot.slane %v405_v33, 2 }
  0x60   :  { %v377_v27 = vmax.f32 %v375_v13, %v376_v59  ;;  %v383_v15 = vmax.f32 %v381_v52, %v382_v34  ;;  %v412_v1 = vrot.slane %v411_v23, 2  ;;  %v418_v57 = vrot.slane %v417_v37, 2 }
  0x61   :  { %v389_v58 = vmax.f32 %v387_v21, %v388_v25  ;;  %v395_v38 = vmax.f32 %v393_v61, %v394_v2  ;;  %v401_v40 = vmax.f32 %v399_v35, %v400_v47  ;;  %v407_v32 = vmax.f32 %v405_v33, %v406_v22 }
  0x62   :  { %v378_v41 = vrot.slane %v377_v27, 1  ;;  %v384_v43 = vrot.slane %v383_v15, 1  ;;  %v413_v49 = vmax.f32 %v411_v23, %v412_v1  ;;  %v419_v53 = vmax.f32 %v417_v37, %v418_v57 }
  0x63   :  { %v390_v50 = vrot.slane %v389_v58, 1  ;;  %v396_v46 = vrot.slane %v395_v38, 1  ;;  %v402_v28 = vrot.slane %v401_v40, 1  ;;  %v408_v62 = vrot.slane %v407_v32, 1 }
  0x64   :  { %v1105_v17 = vmax.f32 %v377_v27, %v378_v41  ;;  %v1107_v36 = vmax.f32 %v383_v15, %v384_v43  ;;  %v414_v4 = vrot.slane %v413_v49, 1  ;;  %v420_v55 = vrot.slane %v419_v53, 1 }
  0x65   :  { %v1109_v5 = vmax.f32 %v389_v58, %v390_v50  ;;  %v1111_v48 = vmax.f32 %v395_v38, %v396_v46  ;;  %v1113_v7 = vmax.f32 %v401_v40, %v402_v28  ;;  %v1115_v19 = vmax.f32 %v407_v32, %v408_v62 }
  0x66   :  { %v1117_v13 = vmax.f32 %v413_v49, %v414_v4  ;;  %v1119_v52 = vmax.f32 %v419_v53, %v420_v55  ;;  %v422_v54 = vrot.slane %v1057_v14, 4  ;;  %v428_v12 = vrot.slane %v1059_v60, 4 }
  0x67   :  { %v434_v21 = vrot.slane %v1061_v45, 4  ;;  %v440_v61 = vrot.slane %v1063_v0, 4  ;;  %v446_v35 = vrot.slane %v1065_v51, 4  ;;  %v452_v33 = vrot.slane %v1067_v39, 4 }
  0x68   :  { %v423_v59 = vmax.f32 %v1057_v14, %v422_v54  ;;  %v429_v34 = vmax.f32 %v1059_v60, %v428_v12  ;;  %v458_v23 = vrot.slane %v1069_v30, 4  ;;  %v464_v37 = vrot.slane %v1071_v26, 4 }
  0x69   :  { %v435_v25 = vmax.f32 %v1061_v45, %v434_v21  ;;  %v441_v2 = vmax.f32 %v1063_v0, %v440_v61  ;;  %v447_v47 = vmax.f32 %v1065_v51, %v446_v35  ;;  %v453_v22 = vmax.f32 %v1067_v39, %v452_v33 }
  0x6a   :  { %v424_v27 = vrot.slane %v423_v59, 2  ;;  %v430_v15 = vrot.slane %v429_v34, 2  ;;  %v459_v1 = vmax.f32 %v1069_v30, %v458_v23  ;;  %v465_v14 = vmax.f32 %v1071_v26, %v464_v37 }
  0x6b   :  { %v436_v57 = vrot.slane %v435_v25, 2  ;;  %v442_v60 = vrot.slane %v441_v2, 2  ;;  %v448_v58 = vrot.slane %v447_v47, 2  ;;  %v454_v38 = vrot.slane %v453_v22, 2 }
  0x6c   :  { %v425_v40 = vmax.f32 %v423_v59, %v424_v27  ;;  %v431_v32 = vmax.f32 %v429_v34, %v430_v15  ;;  %v460_v41 = vrot.slane %v459_v1, 2  ;;  %v466_v45 = vrot.slane %v465_v14, 2 }
  0x6d   :  { %v437_v43 = vmax.f32 %v435_v25, %v436_v57  ;;  %v443_v0 = vmax.f32 %v441_v2, %v442_v60  ;;  %v449_v49 = vmax.f32 %v447_v47, %v448_v58  ;;  %v455_v51 = vmax.f32 %v453_v22, %v454_v38 }
  0x6e   :  { %v426_v53 = vrot.slane %v425_v40, 1  ;;  %v432_v39 = vrot.slane %v431_v32, 1  ;;  %v461_v50 = vmax.f32 %v459_v1, %v460_v41  ;;  %v467_v46 = vmax.f32 %v465_v14, %v466_v45 }
  0x6f   :  { %v438_v28 = vrot.slane %v437_v43, 1  ;;  %v444_v30 = vrot.slane %v443_v0, 1  ;;  %v450_v62 = vrot.slane %v449_v49, 1  ;;  %v456_v26 = vrot.slane %v455_v51, 1 }
  0x70   :  { %v1137_v4 = vmax.f32 %v425_v40, %v426_v53  ;;  %v1139_v55 = vmax.f32 %v431_v32, %v432_v39  ;;  %v462_v54 = vrot.slane %v461_v50, 1  ;;  %v468_v12 = vrot.slane %v467_v46, 1 }
  0x71   :  { %v1141_v21 = vmax.f32 %v437_v43, %v438_v28  ;;  %v1143_v61 = vmax.f32 %v443_v0, %v444_v30  ;;  %v1145_v35 = vmax.f32 %v449_v49, %v450_v62  ;;  %v1147_v33 = vmax.f32 %v455_v51, %v456_v26 }
  0x72   :  { %v1149_v59 = vmax.f32 %v461_v50, %v462_v54  ;;  %v1151_v34 = vmax.f32 %v467_v46, %v468_v12  ;;  %v470_v23 = vrot.slane %v1073_v9, 4  ;;  %v476_v37 = vrot.slane %v1075_v18, 4 }
  0x73   :  { %v482_v25 = vrot.slane %v1077_v24, 4  ;;  %v488_v2 = vrot.slane %v1079_v20, 4  ;;  %v494_v47 = vrot.slane %v1081_v16, 4  ;;  %v500_v22 = vrot.slane %v1083_v44, 4 }
  0x74   :  { %v471_v27 = vmax.f32 %v1073_v9, %v470_v23  ;;  %v477_v15 = vmax.f32 %v1075_v18, %v476_v37  ;;  %v506_v1 = vrot.slane %v1085_v6, 4  ;;  %v512_v14 = vrot.slane %v1087_v8, 4 }
  0x75   :  { %v483_v57 = vmax.f32 %v1077_v24, %v482_v25  ;;  %v489_v60 = vmax.f32 %v1079_v20, %v488_v2  ;;  %v495_v58 = vmax.f32 %v1081_v16, %v494_v47  ;;  %v501_v38 = vmax.f32 %v1083_v44, %v500_v22 }
  0x76   :  { %v472_v40 = vrot.slane %v471_v27, 2  ;;  %v478_v32 = vrot.slane %v477_v15, 2  ;;  %v507_v41 = vmax.f32 %v1085_v6, %v506_v1  ;;  %v513_v9 = vmax.f32 %v1087_v8, %v512_v14 }
  0x77   :  { %v484_v45 = vrot.slane %v483_v57, 2  ;;  %v490_v18 = vrot.slane %v489_v60, 2  ;;  %v496_v43 = vrot.slane %v495_v58, 2  ;;  %v502_v0 = vrot.slane %v501_v38, 2 }
  0x78   :  { %v473_v49 = vmax.f32 %v471_v27, %v472_v40  ;;  %v479_v51 = vmax.f32 %v477_v15, %v478_v32  ;;  %v508_v53 = vrot.slane %v507_v41, 2  ;;  %v514_v24 = vrot.slane %v513_v9, 2 }
  0x79   :  { %v485_v39 = vmax.f32 %v483_v57, %v484_v45  ;;  %v491_v20 = vmax.f32 %v489_v60, %v490_v18  ;;  %v497_v50 = vmax.f32 %v495_v58, %v496_v43  ;;  %v503_v16 = vmax.f32 %v501_v38, %v502_v0 }
  0x7a   :  { %v474_v46 = vrot.slane %v473_v49, 1  ;;  %v480_v44 = vrot.slane %v479_v51, 1  ;;  %v509_v28 = vmax.f32 %v507_v41, %v508_v53  ;;  %v515_v30 = vmax.f32 %v513_v9, %v514_v24 }
  0x7b   :  { %v486_v62 = vrot.slane %v485_v39, 1  ;;  %v492_v6 = vrot.slane %v491_v20, 1  ;;  %v498_v26 = vrot.slane %v497_v50, 1  ;;  %v504_v8 = vrot.slane %v503_v16, 1 }
  0x7c   :  { %v1169_v54 = vmax.f32 %v473_v49, %v474_v46  ;;  %v1171_v12 = vmax.f32 %v479_v51, %v480_v44  ;;  %v510_v23 = vrot.slane %v509_v28, 1  ;;  %v516_v37 = vrot.slane %v515_v30, 1 }
  0x7d   :  { %v1173_v25 = vmax.f32 %v485_v39, %v486_v62  ;;  %v1175_v2 = vmax.f32 %v491_v20, %v492_v6  ;;  %v1177_v47 = vmax.f32 %v497_v50, %v498_v26  ;;  %v1179_v22 = vmax.f32 %v503_v16, %v504_v8 }
  0x7e   :  { %v1181_v27 = vmax.f32 %v509_v28, %v510_v23  ;;  %v1183_v15 = vmax.f32 %v515_v30, %v516_v37  ;;  %v518_v1 = vrot.slane %v1089_v29, 4  ;;  %v524_v14 = vrot.slane %v1091_v31, 4 }
  0x7f   :  { %v530_v57 = vrot.slane %v1093_v10, 4  ;;  %v536_v60 = vrot.slane %v1095_v11, 4  ;;  %v542_v58 = vrot.slane %v1097_v3, 4  ;;  %v548_v38 = vrot.slane %v1099_v63, 4 }
  0x80   :  { %v519_v40 = vmax.f32 %v1089_v29, %v518_v1  ;;  %v525_v32 = vmax.f32 %v1091_v31, %v524_v14  ;;  %v554_v41 = vrot.slane %v1101_v42, 4  ;;  %v560_v9 = vrot.slane %v1103_v56, 4 }
  0x81   :  { %v531_v45 = vmax.f32 %v1093_v10, %v530_v57  ;;  %v537_v18 = vmax.f32 %v1095_v11, %v536_v60  ;;  %v543_v43 = vmax.f32 %v1097_v3, %v542_v58  ;;  %v549_v0 = vmax.f32 %v1099_v63, %v548_v38 }
  0x82   :  { %v520_v49 = vrot.slane %v519_v40, 2  ;;  %v526_v51 = vrot.slane %v525_v32, 2  ;;  %v555_v29 = vmax.f32 %v1101_v42, %v554_v41  ;;  %v561_v31 = vmax.f32 %v1103_v56, %v560_v9 }
  0x83   :  { %v532_v53 = vrot.slane %v531_v45, 2  ;;  %v538_v24 = vrot.slane %v537_v18, 2  ;;  %v544_v39 = vrot.slane %v543_v43, 2  ;;  %v550_v20 = vrot.slane %v549_v0, 2 }
  0x84   :  { %v521_v10 = vmax.f32 %v519_v40, %v520_v49  ;;  %v527_v50 = vmax.f32 %v525_v32, %v526_v51  ;;  %v556_v11 = vrot.slane %v555_v29, 2  ;;  %v562_v16 = vrot.slane %v561_v31, 2 }
  0x85   :  { %v533_v3 = vmax.f32 %v531_v45, %v532_v53  ;;  %v539_v63 = vmax.f32 %v537_v18, %v538_v24  ;;  %v545_v46 = vmax.f32 %v543_v43, %v544_v39  ;;  %v551_v44 = vmax.f32 %v549_v0, %v550_v20 }
  0x86   :  { %v522_v28 = vrot.slane %v521_v10, 1  ;;  %v528_v42 = vrot.slane %v527_v50, 1  ;;  %v557_v30 = vmax.f32 %v555_v29, %v556_v11  ;;  %v563_v56 = vmax.f32 %v561_v31, %v562_v16 }
  0x87   :  { %v534_v62 = vrot.slane %v533_v3, 1  ;;  %v540_v6 = vrot.slane %v539_v63, 1  ;;  %v546_v26 = vrot.slane %v545_v46, 1  ;;  %v552_v8 = vrot.slane %v551_v44, 1 }
  0x88   :  { %v523_v23 = vmax.f32 %v521_v10, %v522_v28  ;;  %v529_v37 = vmax.f32 %v527_v50, %v528_v42  ;;  %v558_v1 = vrot.slane %v557_v30, 1  ;;  %v564_v14 = vrot.slane %v563_v56, 1 }
  0x89   :  { %v535_v57 = vmax.f32 %v533_v3, %v534_v62  ;;  %v541_v60 = vmax.f32 %v539_v63, %v540_v6  ;;  %v547_v58 = vmax.f32 %v545_v46, %v546_v26  ;;  %v553_v38 = vmax.f32 %v551_v44, %v552_v8 }
  0x8a   :  { %v559_v40 = vmax.f32 %v557_v30, %v558_v1  ;;  %v565_v32 = vmax.f32 %v563_v56, %v564_v14  ;;  %v599_v41 = vsel %vm598_vm0, %v1109_v5, %v1105_v17  ;;  %v612_v9 = vsel %vm598_vm0, %v1111_v48, %v1107_v36 }
  0x8b   :  { %v601_v45 = vsel %vm600_vm1, %v1113_v7, %v599_v41  ;;  %v613_v18 = vsel %vm600_vm1, %v1115_v19, %v612_v9  ;;  %v619_v43 = vsel %vm598_vm0, %v1173_v25, %v1169_v54  ;;  %v626_v0 = vsel %vm598_vm0, %v1175_v2, %v1171_v12 }
  0x8c   :  { %v603_v17 = vsel %vm602_vm2, %v1117_v13, %v601_v45  ;;  %v614_v36 = vsel %vm602_vm2, %v1119_v52, %v613_v18  ;;  %v620_v5 = vsel %vm600_vm1, %v1177_v47, %v619_v43  ;;  %v627_v48 = vsel %vm600_vm1, %v1179_v22, %v626_v0 }
  0x8d   :  { %v605_v7 = vsel %vm604_vm3, %v1137_v4, %v603_v17  ;;  %v615_v19 = vsel %vm604_vm3, %v1139_v55, %v614_v36  ;;  %v621_v54 = vsel %vm602_vm2, %v1181_v27, %v620_v5  ;;  %v628_v13 = vsel %vm602_vm2, %v1183_v15, %v627_v48 }
  0x8e   :  { %v607_v52 = vsel %vm606_vm4, %v1141_v21, %v605_v7  ;;  %v616_v12 = vsel %vm606_vm4, %v1143_v61, %v615_v19  ;;  %v622_v25 = vsel %vm604_vm3, %v523_v23, %v621_v54  ;;  %v629_v2 = vsel %vm604_vm3, %v529_v37, %v628_v13 }
  0x8f   :  { %v609_v4 = vsel %vm608_vm5, %v1145_v35, %v607_v52  ;;  %v617_v55 = vsel %vm608_vm5, %v1147_v33, %v616_v12  ;;  %v623_v47 = vsel %vm606_vm4, %v535_v57, %v622_v25  ;;  %v630_v22 = vsel %vm606_vm4, %v541_v60, %v629_v2 }
  0x90   :  { %v611_v21 = vsel %vm610_vm6, %v1149_v59, %v609_v4  ;;  %v618_v61 = vsel %vm610_vm6, %v1151_v34, %v617_v55  ;;  %v624_v27 = vsel %vm608_vm5, %v547_v58, %v623_v47  ;;  %v631_v15 = vsel %vm608_vm5, %v553_v38, %v630_v22 }
  0x91   :  { %v625_v49 = vsel %vm610_vm6, %v559_v40, %v624_v27  ;;  %v632_v35 = vsel %vm610_vm6, %v565_v32, %v631_v15  ;;  %637 = vst [vmem:[%s1266_s1] sm:$0xff] %v611_v21  ;;  %638 = vst [vmem:[%s1266_s1 + $0x8] sm:$0xff] %v618_v61 }
  0x92   :  { %639 = vst [vmem:[%s1266_s1 + $0x10] sm:$0xff] %v625_v49  ;;  %640 = vst [vmem:[%s1266_s1 + $0x18] sm:$0xff] %v632_v35 }
  0x93   :  { %645 = vsyncpa [#allocation3], 1 }

</bundles_post_ra>
